<compile_context>
chip_gen: v6e
topology: v6e:2x2x1
jax: 0.10.0
libtpu: 0.0.40
codegen_flags: <defaults>
</compile_context>

<pallas_src>
import functools

import jax
import jax.numpy as jnp
from jax.experimental import pallas as pl
from jax.experimental.pallas import tpu as pltpu


def _round_up(n, m):
    return ((n + m - 1) // m) * m


def ligru_cell_kernel(xh_ref, h_ref, w_ref, b_ref, out_ref):
    """xh: (TB, Kp) bf16, h: (TB, Hp) f32, w: (Kp, 2*Hp) bf16, b: (1, 2*Hp) f32."""
    hp = out_ref.shape[-1]
    # Single fused MXU matmul, bf16 operands, f32 accumulation.
    acc = jnp.dot(xh_ref[...], w_ref[...],
                  preferred_element_type=jnp.float32) + b_ref[...]
    z = jax.nn.sigmoid(acc[:, :hp])           # update gate
    h_cand = jnp.maximum(acc[:, hp:], 0.0)    # relu candidate
    h = h_ref[...].astype(jnp.float32)
    out_ref[...] = ((1.0 - z) * h + z * h_cand).astype(out_ref.dtype)


def fuse_ligru_params(wxz_t, whz_t, wxh_t, whh_t, bz, bh, *, kp, hp,
                      compute_dtype=jnp.bfloat16):
    """Pack 4 weights / 2 biases into one lane-dense (kp, 2*hp) slab.

    Weights are PRE-TRANSPOSED: (in_features, out_features), i.e. x @ W matches
    PyTorch's x @ W.T.  Column layout: [0:hp) = z gate, [hp:2*hp) = candidate.
    In a recurrent loop, call this ONCE outside the time loop.
    """
    in_sz, hid = wxz_t.shape
    w = jnp.zeros((kp, 2 * hp), compute_dtype)
    w = w.at[:in_sz, :hid].set(wxz_t.astype(compute_dtype))
    w = w.at[in_sz:in_sz + hid, :hid].set(whz_t.astype(compute_dtype))
    w = w.at[:in_sz, hp:hp + hid].set(wxh_t.astype(compute_dtype))
    w = w.at[in_sz:in_sz + hid, hp:hp + hid].set(whh_t.astype(compute_dtype))
    b = jnp.zeros((1, 2 * hp), jnp.float32)
    b = b.at[0, :hid].set(bz.reshape(-1).astype(jnp.float32))
    b = b.at[0, hp:hp + hid].set(bh.reshape(-1).astype(jnp.float32))
    return w, b


@functools.partial(jax.jit, static_argnames=("compute_dtype",))
def ligru_cell(x, h, wxz_t, whz_t, wxh_t, whh_t, bz, bh,
               *, compute_dtype=jnp.bfloat16):
    """Single LiGRU step: (1 - z) * h + z * relu(...), z = sigmoid(...)."""
    B, in_sz = x.shape
    _, hid = h.shape
    hp = _round_up(hid, 128)            # lane-dense gate/output width
    kp = _round_up(in_sz + hid, 128)    # lane-dense contraction width
    tb = min(_round_up(B, 8), 128)      # batch tile (sublane-aligned)
    bp = _round_up(B, tb)
    grid = (pl.cdiv(bp, tb),)

    # Fused, zero-padded operands.
    w, b = fuse_ligru_params(wxz_t, whz_t, wxh_t, whh_t, bz, bh,
                             kp=kp, hp=hp, compute_dtype=compute_dtype)
    xh = jnp.zeros((bp, kp), compute_dtype)
    xh = xh.at[:B, :in_sz].set(x.astype(compute_dtype))
    xh = xh.at[:B, in_sz:in_sz + hid].set(h.astype(compute_dtype))
    hpad = jnp.zeros((bp, hp), h.dtype).at[:B, :hid].set(h)

    out = pl.pallas_call(
        ligru_cell_kernel,
        out_shape=jax.ShapeDtypeStruct((bp, hp), h.dtype),
        grid=grid,
        in_specs=[
            pl.BlockSpec((tb, kp), lambda i: (i, 0)),       # [x | h] batch tile
            pl.BlockSpec((tb, hp), lambda i: (i, 0)),       # h batch tile (f32)
            pl.BlockSpec((kp, 2 * hp), lambda i: (0, 0)),   # fused W, VMEM-resident
            pl.BlockSpec((1, 2 * hp), lambda i: (0, 0)),    # fused bias
        ],
        out_specs=pl.BlockSpec((tb, hp), lambda i: (i, 0)),
        compiler_params=pltpu.CompilerParams(
            dimension_semantics=("parallel",)),  # v7x: shard batch across 2 TCs
    )(xh, hpad, w, b)
    return out[:B, :hid]


def reference_ligru_f32(x, h, wxz_t, whz_t, wxh_t, whh_t, bz, bh):
    z = jax.nn.sigmoid(x @ wxz_t + h @ whz_t + bz)
    h_cand = jnp.maximum(x @ wxh_t + h @ whh_t + bh, 0.0)
    return (1.0 - z) * h + z * h_cand


def reference_ligru_bf16(x, h, wxz_t, whz_t, wxh_t, whh_t, bz, bh):
    c = lambda a: a.astype(jnp.bfloat16)
    d = lambda a, w: jnp.dot(c(a), c(w), preferred_element_type=jnp.float32)
    z = jax.nn.sigmoid(d(x, wxz_t) + d(h, whz_t) + bz)
    h_cand = jnp.maximum(d(x, wxh_t) + d(h, whh_t) + bh, 0.0)
    return (1.0 - z) * h + z * h_cand


if __name__ == "__main__":
    key = jax.random.PRNGKey(0)
    B, IN, HID = 8, 16, 32

    ks = jax.random.split(key, 8)
    x = jax.random.normal(ks[0], (B, IN), dtype=jnp.float32)
    h = jax.random.normal(ks[1], (B, HID), dtype=jnp.float32)
    # PyTorch stores Linear weight as (out, in); we keep the transposed layout.
    wxz_t = jax.random.normal(ks[2], (IN, HID), dtype=jnp.float32) * 0.1
    whz_t = jax.random.normal(ks[3], (HID, HID), dtype=jnp.float32) * 0.1
    wxh_t = jax.random.normal(ks[4], (IN, HID), dtype=jnp.float32) * 0.1
    whh_t = jax.random.normal(ks[5], (HID, HID), dtype=jnp.float32) * 0.1
    bz = jax.random.normal(ks[6], (1, HID), dtype=jnp.float32) * 0.1
    bh = jax.random.normal(ks[7], (1, HID), dtype=jnp.float32) * 0.1

    out = ligru_cell(x, h, wxz_t, whz_t, wxh_t, whh_t, bz, bh)
    out = jax.block_until_ready(out)
    assert out.shape == (B, HID)
    assert out.dtype == h.dtype

    # Tight check vs a reference using the same bf16-matmul / f32-accumulate
    # precision, and a loose check vs the pure-f32 PyTorch-equivalent math.
    ref_bf16 = reference_ligru_bf16(x, h, wxz_t, whz_t, wxh_t, whh_t, bz, bh)
    ref_f32 = reference_ligru_f32(x, h, wxz_t, whz_t, wxh_t, whh_t, bz, bh)
    assert jnp.allclose(out, ref_bf16, atol=1e-3, rtol=1e-3), "mismatch vs bf16 ref"
    assert jnp.allclose(out, ref_f32, atol=3e-2, rtol=3e-2), "mismatch vs f32 ref"

    print("KERNEL_OK")
</pallas_src>

<mosaic_0001>
module attributes {stable_mosaic.version = 11 : i64} {
  func.func @ligru_cell_kernel(%arg0: i32, %arg1: memref<8x128xbf16, #tpu.memory_space<vmem>>, %arg2: memref<8x128xf32, #tpu.memory_space<vmem>>, %arg3: memref<128x256xbf16, #tpu.memory_space<vmem>>, %arg4: memref<1x256xf32, #tpu.memory_space<vmem>>, %arg5: memref<8x128xf32, #tpu.memory_space<vmem>>) attributes {dimension_semantics = [#tpu.dimension_semantics<parallel>], iteration_bounds = array<i64: 1>, scalar_prefetch = 0 : i64, scratch_operands = 0 : i64, tpu.core_type = #tpu.core_type<tc>, window_params = [{transform_indices = @transform_0, window_bounds = array<i64: 8, 128>}, {transform_indices = @transform_1, window_bounds = array<i64: 8, 128>}, {pipeline_mode = #tpu.pipeline_mode<synchronous>, transform_indices = @transform_2, window_bounds = array<i64: 128, 256>}, {pipeline_mode = #tpu.pipeline_mode<synchronous>, transform_indices = @transform_3, window_bounds = array<i64: 1, 256>}, {transform_indices = @transform_4, window_bounds = array<i64: 8, 128>}]} {
    %c0 = arith.constant 0 : index
    %c0_0 = arith.constant 0 : index
    %0 = vector.load %arg1[%c0, %c0_0] : memref<8x128xbf16, #tpu.memory_space<vmem>>, vector<8x128xbf16>
    %c0_1 = arith.constant 0 : index
    %c0_2 = arith.constant 0 : index
    %1 = vector.load %arg3[%c0_1, %c0_2] : memref<128x256xbf16, #tpu.memory_space<vmem>>, vector<128x256xbf16>
    %cst = arith.constant dense<0.000000e+00> : vector<8x256xf32>
    %2 = tpu.matmul %0, %1, %cst {dimension_numbers = #tpu.dot_dimension_numbers<[1], [0], [0], [1], [0, 0, 1, 1], [], []>} : vector<8x128xbf16>, vector<128x256xbf16>, vector<8x256xf32> -> vector<8x256xf32>
    %c0_3 = arith.constant 0 : index
    %c0_4 = arith.constant 0 : index
    %3 = vector.load %arg4[%c0_3, %c0_4] : memref<1x256xf32, #tpu.memory_space<vmem>>, vector<1x256xf32>
    %4 = vector.broadcast %3 : vector<1x256xf32> to vector<8x256xf32>
    %5 = arith.addf %2, %4 : vector<8x256xf32>
    %6 = vector.extract_strided_slice %5 {offsets = [0, 0], sizes = [8, 128], strides = [1, 1]} : vector<8x256xf32> to vector<8x128xf32>
    %7 = arith.negf %6 : vector<8x128xf32>
    %8 = math.exp %7 : vector<8x128xf32>
    %cst_5 = arith.constant 1.000000e+00 : f32
    %9 = vector.broadcast %cst_5 : f32 to vector<8x128xf32>
    %10 = arith.addf %9, %8 : vector<8x128xf32>
    %11 = arith.divf %9, %10 : vector<8x128xf32>
    %12 = vector.extract_strided_slice %5 {offsets = [0, 128], sizes = [8, 128], strides = [1, 1]} : vector<8x256xf32> to vector<8x128xf32>
    %cst_6 = arith.constant 0.000000e+00 : f32
    %13 = vector.broadcast %cst_6 : f32 to vector<8x128xf32>
    %14 = arith.maximumf %12, %13 : vector<8x128xf32>
    %c0_7 = arith.constant 0 : index
    %c0_8 = arith.constant 0 : index
    %15 = vector.load %arg2[%c0_7, %c0_8] : memref<8x128xf32, #tpu.memory_space<vmem>>, vector<8x128xf32>
    %cst_9 = arith.constant 1.000000e+00 : f32
    %16 = vector.broadcast %cst_9 : f32 to vector<8x128xf32>
    %17 = arith.subf %16, %11 : vector<8x128xf32>
    %18 = arith.mulf %17, %15 : vector<8x128xf32>
    %19 = arith.mulf %11, %14 : vector<8x128xf32>
    %20 = arith.addf %18, %19 : vector<8x128xf32>
    %c0_10 = arith.constant 0 : index
    %c0_11 = arith.constant 0 : index
    %21 = vector.load %arg5[%c0_10, %c0_11] : memref<8x128xf32, #tpu.memory_space<vmem>>, vector<8x128xf32>
    tpu.vector_store %arg5[%c0_10, %c0_11], %20 {strides = array<i32>} : memref<8x128xf32, #tpu.memory_space<vmem>>, vector<8x128xf32>,
    return
  }
  func.func @transform_0(%arg0: i32) -> (i32, i32) {
    %c0_i32 = arith.constant 0 : i32
    %c0_i32_0 = arith.constant 0 : i32
    return %arg0, %c0_i32 : i32, i32
  }
  func.func @transform_1(%arg0: i32) -> (i32, i32) {
    %c0_i32 = arith.constant 0 : i32
    %c0_i32_0 = arith.constant 0 : i32
    return %arg0, %c0_i32 : i32, i32
  }
  func.func @transform_2(%arg0: i32) -> (i32, i32) {
    %c0_i32 = arith.constant 0 : i32
    %c0_i32_0 = arith.constant 0 : i32
    %c0_i32_1 = arith.constant 0 : i32
    return %c0_i32, %c0_i32_0 : i32, i32
  }
  func.func @transform_3(%arg0: i32) -> (i32, i32) {
    %c0_i32 = arith.constant 0 : i32
    %c0_i32_0 = arith.constant 0 : i32
    %c0_i32_1 = arith.constant 0 : i32
    return %c0_i32, %c0_i32_0 : i32, i32
  }
  func.func @transform_4(%arg0: i32) -> (i32, i32) {
    %c0_i32 = arith.constant 0 : i32
    %c0_i32_0 = arith.constant 0 : i32
    return %arg0, %c0_i32 : i32, i32
  }
}

</mosaic_0001>

<bundles_post_ra>
// kernel: ligru_cell.1
= control target key start
LH: loop header
LB: loop body
LE: loop exit
PB: predicated region body
PF: predicated region fallthrough
CT: control target
= control target key end

     0   :  { %v265_v2 = vmov 0   ;;  %s352_s0 = inlined_call_operand.vmem [shape: bf16[8,128], index: 0, kind: input, shape index: {}]   ;;  %s353_s1 = inlined_call_operand.vmem [shape: f32[8,128], index: 1, kind: input, shape index: {}]   ;;  %s354_s2 = inlined_call_operand.vmem [shape: bf16[128,256], index: 2, kind: input, shape index: {}]   ;;  %s355_s3 = inlined_call_operand.vmem [shape: f32[1,256], index: 3, kind: input, shape index: {}]   ;;  %s356_s4 = inlined_call_operand.hbm [shape: f32[8,128], index: 4, kind: output, shape index: {}]  }
   0x1   :  { %v215_v0 = vld [vmem:[%s354_s2 + $0x74] ss:$8 sps:$4 sm:$0xff]   ;;  %v217_v1 = vld [vmem:[%s354_s2 + $0x70] ss:$8 sps:$4 sm:$0xff]   ;;  %160 = vmatprep.mubr.bf16.mxu0 %v265_v2  ;;  %v218_v3 = vld [vmem:[%s354_s2 + $0x64] ss:$8 sps:$4 sm:$0xff]  }
   0x2   :  { %128 = vmatprep.subr.bf16.mxu0 %v215_v0  ;;  %v220_v4 = vld [vmem:[%s354_s2 + $0x60] ss:$8 sps:$4 sm:$0xff]   ;;  %v221_v5 = vld [vmem:[%s354_s2 + $0x54] ss:$8 sps:$4 sm:$0xff]   ;;  %v223_v6 = vld [vmem:[%s354_s2 + $0x50] ss:$8 sps:$4 sm:$0xff]  }
   0x3   :  { %129 = vmatpush1.bf16.msra.mxu0 %v217_v1  ;;  %v224_v7 = vld [vmem:[%s354_s2 + $0x44] ss:$8 sps:$4 sm:$0xff]   ;;  %v226_v8 = vld [vmem:[%s354_s2 + $0x40] ss:$8 sps:$4 sm:$0xff]  }
   0x4   :  { %130 = vmatprep.subr.bf16.mxu0 %v218_v3 }
   0x7   :  { %131 = vmatpush1.bf16.msra.mxu0 %v220_v4 }
   0x8   :  { %132 = vmatprep.subr.bf16.mxu0 %v221_v5 }
   0xb   :  { %133 = vmatpush1.bf16.msra.mxu0 %v223_v6 }
   0xc   :  { %9 = vsyncpa [#allocation3], 0  ;;  %134 = vmatprep.subr.bf16.mxu0 %v224_v7  ;;  %v227_v9 = vld [vmem:[%s354_s2 + $0x34] ss:$8 sps:$4 sm:$0xff]   ;;  %v229_v10 = vld [vmem:[%s354_s2 + $0x30] ss:$8 sps:$4 sm:$0xff]   ;;  %v38_v18 = vlaneseq }
   0xd   :  { %v230_v11 = vld [vmem:[%s354_s2 + $0x24] ss:$8 sps:$4 sm:$0xff]   ;;  %v232_v12 = vld [vmem:[%s354_s2 + $0x20] ss:$8 sps:$4 sm:$0xff]   ;;  %v233_v13 = vld [vmem:[%s354_s2 + $0x14] ss:$8 sps:$4 sm:$0xff]  }
   0xe   :  { %v235_v14 = vld [vmem:[%s354_s2 + $0x10] ss:$8 sps:$4 sm:$0xff]   ;;  %v236_v15 = vld [vmem:[%s354_s2 + $0x4] ss:$8 sps:$4 sm:$0xff]   ;;  %v238_v16 = vld [vmem:[%s354_s2] ss:$8 sps:$4 sm:$0xff]  }
   0xf   :  { %135 = vmatpush1.bf16.msra.mxu0 %v226_v8  ;;  %v19_v17 = vld [vmem:[%s352_s0] sm:$0xf]  ;;  %v39_v19 = vshrl.u32 %v38_v18, 7 }
  0x10   :  { %136 = vmatprep.subr.bf16.mxu0 %v227_v9  ;;  %v36_v21 = vld [vmem:[%s355_s3] sm:$0x3]  ;;  %s266_s3 = smov [#allocation2]  }
  0x11   :  { %v40_v20 = vsub.s32 0, %v39_v19  ;;  %v44_v31 = vsub.s32 1, %v39_v19  ;;  %v176_v35 = vld [vmem:[%s353_s1] sm:$0xff]  ;;  %s188_s25 = sshll.u32 %s266_s3, 4  ;;  %s189_s25 = int_to_ptr.vmem [resolvable:$true] %s188_s25 }
  0x12   :  { %s243_s26 = scalar_lea.vmem %s189_s25, 128  ;;  %p248_p1 = scmp.lt.s32.totalorder %s189_s25, %s189_s25 }
  0x13   :  { %137 = vmatpush1.bf16.msra.mxu0 %v229_v10  ;;  %v41_v22 = vrot.slane %v36_v21, %v40_v20  ;;  %v45_v32 = vrot.slane %v36_v21, %v44_v31  ;;  %p244_p0 = scmp.ne.s32.totalorder %s189_s25, %s243_s26  ;;  %p249_p2 = scmp.lt.s32.totalorder %s243_s26, %s243_s26 }
  0x14   :  { %138 = vmatprep.subr.bf16.mxu0 %v230_v11 }
  0x15   :  { %p250_p3 = por %p249_p2, %p248_p1 }
  0x17   :  { %139 = vmatpush1.bf16.msra.mxu0 %v232_v12  ;;  %p251_p4 = pnand %p250_p3, %p244_p0 }
  0x18   :  { %140 = vmatprep.subr.bf16.mxu0 %v233_v13 }
  0x1b   :  { %141 = vmatpush1.bf16.msra.mxu0 %v235_v14 }
  0x1c   :  { %142 = vmatprep.subr.bf16.mxu0 %v236_v15 }
  0x1f   :  { %143 = vmatpush1.bf16.msra.mxu0 %v238_v16 }
  0x22   :  { %161 = vmatmul.mubr.bf16.vlgmr.msra.gmra.mxu0 %v19_v17 }
  0xe2   :  { %v162_v23 = vpop.f32.mrf.mxu0 }
  0xe3   :  { %v163_v24 = vadd.f32 %v162_v23, %v41_v22 }
  0xe4   :  { %v164_v25 = vpop.f32.mrf.mxu0 }
  0xe5   :  { %v212_v26 = vmul.f32 -1.442695, %v163_v24  ;;  %v165_v33 = vadd.f32 %v164_v25, %v45_v32 }
  0xe6   :  { %v166_v27 = vpop.f32.mrf.mxu0 }
  0xe7   :  { %239 = vpow2.f32 %v212_v26  ;;  %v175_v36 = vmax.f32 %v165_v33, 0.0 }
  0xe8   :  { %v167_v28 = vpop.f32.mrf.mxu0 }
  0xf4   :  { %v240_v29 = vpop.eup %239 }
  0xf5   :  { %v172_v30 = vadd.f32 1.0, %v240_v29 }
  0xf7   :  { %241 = vrcp.f32 %v172_v30 }
 0x104   :  { %v242_v34 = vpop.eup %241 }
 0x105   :  { %v177_v37 = vsub.f32 1.0, %v242_v34  ;;  %v179_v38 = vmul.f32 %v242_v34, %v175_v36 }
 0x107   :  { %v178_v39 = vmul.f32 %v177_v37, %v176_v35 }
 0x109   :  { %v180_v40 = vadd.f32 %v179_v38, %v178_v39 }
 0x10b   :  { %181 = vst [vmem:[#allocation2] sm:$0xff] %v180_v40 }
 0x10c   :  { %254 = shalt.err (!%p251_p4)
}
 0x10d   :  { %191 = dma.vmem_to_hbm [thread:$0]  %s189_s25, 128, %s356_s4, [#allocation3]  }
 0x10e   :  { %263 = dma.done.wait [#allocation3], 128  }
 0x10f   :  { %264 = vsyncadd [#allocation3], 4294967168 }
 0x110   :  { %195 = vsyncpa [#allocation3], 1 }

</bundles_post_ra>
